<compile_context>
chip_gen: v7x
topology: tpu7x:2x2x1
jax: 0.10.0
libtpu: 0.0.40
codegen_flags: <defaults>
</compile_context>

<pallas_src>
import functools

import jax
import jax.numpy as jnp
from jax.experimental import pallas as pl
from jax.experimental.pallas import tpu as pltpu

OUT_PAD = 128  # lane-dense output slab width (q1 -> col 0, q2 -> col 1)


def _round_up(x, m):
    return ((x + m - 1) // m) * m


def critic_kernel(s_ref, a_ref, w_in_s_ref, w_in_a_ref, b_in_ref,
                  w_mid_ref, b_mid_ref, w_out_ref, b_out_ref, out_ref):
    # Layer 1: fc1 & fc4 fused along the output axis; the state/action concat
    # is replaced by splitting the contraction (s@W_s + a@W_a).
    h = (jnp.dot(s_ref[...], w_in_s_ref[...], preferred_element_type=jnp.float32)
         + jnp.dot(a_ref[...], w_in_a_ref[...], preferred_element_type=jnp.float32)
         + b_in_ref[...])
    h = jnp.maximum(h, 0.0)

    # Layer 2: fc2 & fc5 fused as one block-diagonal (2H, 2H) matmul.
    h = jnp.dot(h.astype(w_mid_ref.dtype), w_mid_ref[...],
                preferred_element_type=jnp.float32) + b_mid_ref[...]
    h = jnp.maximum(h, 0.0)

    # Layer 3: fc3 & fc6 fused, zero-padded to a lane-dense 128-wide output.
    out_ref[...] = (jnp.dot(h.astype(w_out_ref.dtype), w_out_ref[...],
                            preferred_element_type=jnp.float32)
                    + b_out_ref[...]).astype(out_ref.dtype)


@functools.partial(jax.jit, static_argnames=("block_b",))
def critic_forward(s, a, packed, *, block_b=256):
    """s: (B, n_states), a: (B, n_actions). Returns (q1, q2), each (B, 1) f32."""
    (w_in_s, w_in_a, b_in, w_mid, b_mid, w_out, b_out) = packed
    B, n_states = s.shape
    n_actions = a.shape[1]
    h2 = w_in_s.shape[1]
    out_pad = w_out.shape[1]
    compute_dtype = w_in_s.dtype

    # Batch tile: multiple of 8 (f32 sublane); pad the batch up to a full tile.
    tb = min(block_b, _round_up(B, 8))
    b_pad = _round_up(B, tb)
    if b_pad != B:
        pad = b_pad - B
        s = jnp.pad(s, ((0, pad), (0, 0)))
        a = jnp.pad(a, ((0, pad), (0, 0)))
    s = s.astype(compute_dtype)
    a = a.astype(compute_dtype)

    grid = (b_pad // tb,)

    flops = 2 * b_pad * ((n_states + n_actions) * h2 + h2 * h2 + h2 * out_pad)
    bytes_accessed = (s.size * s.dtype.itemsize + a.size * a.dtype.itemsize
                      + sum(p.size * p.dtype.itemsize for p in packed)
                      + b_pad * out_pad * 4)

    out = pl.pallas_call(
        critic_kernel,
        out_shape=jax.ShapeDtypeStruct((b_pad, out_pad), jnp.float32),
        grid_spec=pltpu.PrefetchScalarGridSpec(
            num_scalar_prefetch=0,
            grid=grid,
            in_specs=[
                pl.BlockSpec((tb, n_states), lambda i: (i, 0)),    # s tile
                pl.BlockSpec((tb, n_actions), lambda i: (i, 0)),   # a tile
                pl.BlockSpec((n_states, h2), lambda i: (0, 0)),    # W_in (state rows)
                pl.BlockSpec((n_actions, h2), lambda i: (0, 0)),   # W_in (action rows)
                pl.BlockSpec((1, h2), lambda i: (0, 0)),           # b_in
                pl.BlockSpec((h2, h2), lambda i: (0, 0)),          # W_mid (block-diag)
                pl.BlockSpec((1, h2), lambda i: (0, 0)),           # b_mid
                pl.BlockSpec((h2, out_pad), lambda i: (0, 0)),     # W_out (padded)
                pl.BlockSpec((1, out_pad), lambda i: (0, 0)),      # b_out (padded)
            ],
            out_specs=pl.BlockSpec((tb, out_pad), lambda i: (i, 0)),
        ),
        compiler_params=pltpu.CompilerParams(
            dimension_semantics=("parallel",),       # v7x: shard batch over 2 TCs
            vmem_limit_bytes=32 * 1024 * 1024,       # safe on v5e/v6e/v7x
        ),
        cost_estimate=pl.CostEstimate(
            flops=flops, transcendentals=0, bytes_accessed=bytes_accessed),
    )(s, a, w_in_s, w_in_a, b_in, w_mid, b_mid, w_out, b_out)

    q1 = out[:B, 0:1]
    q2 = out[:B, 1:2]
    return q1, q2


def init_linear(key, fan_in, fan_out):
    """Deterministic PyTorch-style uniform init; weight stored as (in, out)."""
    kw, kb = jax.random.split(key)
    bound = 1.0 / jnp.sqrt(jnp.float32(fan_in))
    w = jax.random.uniform(kw, (fan_in, fan_out), jnp.float32, -bound, bound)
    b = jax.random.uniform(kb, (1, fan_out), jnp.float32, -bound, bound)
    return w, b


def make_params(key, n_states, n_actions, hidden_dim):
    in_dim = n_states + n_actions
    keys = jax.random.split(key, 6)
    w1, b1 = init_linear(keys[0], in_dim, hidden_dim)
    w2, b2 = init_linear(keys[1], hidden_dim, hidden_dim)
    w3, b3 = init_linear(keys[2], hidden_dim, 1)
    w4, b4 = init_linear(keys[3], in_dim, hidden_dim)
    w5, b5 = init_linear(keys[4], hidden_dim, hidden_dim)
    w6, b6 = init_linear(keys[5], hidden_dim, 1)
    return (w1, b1, w2, b2, w3, b3, w4, b4, w5, b5, w6, b6)


def pack_params(params, n_states, dtype=jnp.float32, out_pad=OUT_PAD):
    """Fuse the twin-head weights as described above. `dtype` may be bf16 on
    v6e/v7x; biases / epilogue stay f32."""
    (w1, b1, w2, b2, w3, b3, w4, b4, w5, b5, w6, b6) = params
    H = w1.shape[1]

    w_in = jnp.concatenate([w1, w4], axis=1)            # (in_dim, 2H)
    w_in_s = w_in[:n_states, :]                         # (n_states, 2H)
    w_in_a = w_in[n_states:, :]                         # (n_actions, 2H)
    b_in = jnp.concatenate([b1, b4], axis=1)            # (1, 2H)

    w_mid = jnp.zeros((2 * H, 2 * H), jnp.float32)      # block-diagonal
    w_mid = w_mid.at[:H, :H].set(w2).at[H:, H:].set(w5)
    b_mid = jnp.concatenate([b2, b5], axis=1)           # (1, 2H)

    w_out = jnp.zeros((2 * H, out_pad), jnp.float32)    # lane-dense padded head
    w_out = w_out.at[:H, 0:1].set(w3).at[H:, 1:2].set(w6)
    b_out = jnp.zeros((1, out_pad), jnp.float32)
    b_out = b_out.at[0, 0].set(b3[0, 0]).at[0, 1].set(b6[0, 0])

    return (w_in_s.astype(dtype), w_in_a.astype(dtype), b_in.astype(jnp.float32),
            w_mid.astype(dtype), b_mid.astype(jnp.float32),
            w_out.astype(dtype), b_out.astype(jnp.float32))


def critic_reference(s, a, params):
    (w1, b1, w2, b2, w3, b3, w4, b4, w5, b5, w6, b6) = params
    sa = jnp.concatenate([s, a], axis=1)
    h = jnp.maximum(sa @ w1 + b1, 0.0)
    h = jnp.maximum(h @ w2 + b2, 0.0)
    q1 = h @ w3 + b3
    g = jnp.maximum(sa @ w4 + b4, 0.0)
    g = jnp.maximum(g @ w5 + b5, 0.0)
    q2 = g @ w6 + b6
    return q1, q2


if __name__ == "__main__":
    n_states, n_actions, hidden_dim = 8, 4, 32

    key = jax.random.PRNGKey(0)
    k_params, k_s, k_a = jax.random.split(key, 3)

    params = make_params(k_params, n_states, n_actions, hidden_dim)
    packed = pack_params(params, n_states, dtype=jnp.float32)

    # Primary test: batch = 8 (exact tile).
    batch = 8
    s = jax.random.normal(k_s, (batch, n_states), jnp.float32)
    a = jax.random.normal(k_a, (batch, n_actions), jnp.float32)

    q1, q2 = critic_forward(s, a, packed)
    jax.block_until_ready((q1, q2))

    q1_ref, q2_ref = critic_reference(s, a, params)
    assert q1.shape == (batch, 1) and q2.shape == (batch, 1)
    assert jnp.allclose(q1, q1_ref, atol=1e-5, rtol=1e-5)
    assert jnp.allclose(q2, q2_ref, atol=1e-5, rtol=1e-5)

    # Secondary test: ragged batch (exercises the pad-to-tile path).
    batch2 = 5
    s2 = jax.random.normal(jax.random.PRNGKey(1), (batch2, n_states), jnp.float32)
    a2 = jax.random.normal(jax.random.PRNGKey(2), (batch2, n_actions), jnp.float32)
    p1, p2 = critic_forward(s2, a2, packed)
    jax.block_until_ready((p1, p2))
    r1, r2 = critic_reference(s2, a2, params)
    assert p1.shape == (batch2, 1) and p2.shape == (batch2, 1)
    assert jnp.allclose(p1, r1, atol=1e-5, rtol=1e-5)
    assert jnp.allclose(p2, r2, atol=1e-5, rtol=1e-5)

    # Tertiary test: multi-tile grid (block_b=8, batch=24 -> 3 grid steps).
    batch3 = 24
    s3 = jax.random.normal(jax.random.PRNGKey(3), (batch3, n_states), jnp.float32)
    a3 = jax.random.normal(jax.random.PRNGKey(4), (batch3, n_actions), jnp.float32)
    t1, t2 = critic_forward(s3, a3, packed, block_b=8)
    jax.block_until_ready((t1, t2))
    u1, u2 = critic_reference(s3, a3, params)
    assert jnp.allclose(t1, u1, atol=1e-5, rtol=1e-5)
    assert jnp.allclose(t2, u2, atol=1e-5, rtol=1e-5)

    print("KERNEL_OK")
</pallas_src>

<mosaic_0001>
module attributes {stable_mosaic.version = 11 : i64} {
  func.func @critic_kernel(%arg0: i32, %arg1: memref<8x8xf32, #tpu.memory_space<vmem>>, %arg2: memref<8x4xf32, #tpu.memory_space<vmem>>, %arg3: memref<8x64xf32, #tpu.memory_space<vmem>>, %arg4: memref<4x64xf32, #tpu.memory_space<vmem>>, %arg5: memref<1x64xf32, #tpu.memory_space<vmem>>, %arg6: memref<64x64xf32, #tpu.memory_space<vmem>>, %arg7: memref<1x64xf32, #tpu.memory_space<vmem>>, %arg8: memref<64x128xf32, #tpu.memory_space<vmem>>, %arg9: memref<1x128xf32, #tpu.memory_space<vmem>>, %arg10: memref<8x128xf32, #tpu.memory_space<vmem>>) attributes {dimension_semantics = [#tpu.dimension_semantics<parallel>], iteration_bounds = array<i64: 1>, scalar_prefetch = 0 : i64, scratch_operands = 0 : i64, tpu.core_type = #tpu.core_type<tc>, window_params = [{transform_indices = @transform_0, window_bounds = array<i64: 8, 8>}, {transform_indices = @transform_1, window_bounds = array<i64: 8, 4>}, {pipeline_mode = #tpu.pipeline_mode<synchronous>, transform_indices = @transform_2, window_bounds = array<i64: 8, 64>}, {pipeline_mode = #tpu.pipeline_mode<synchronous>, transform_indices = @transform_3, window_bounds = array<i64: 4, 64>}, {pipeline_mode = #tpu.pipeline_mode<synchronous>, transform_indices = @transform_4, window_bounds = array<i64: 1, 64>}, {pipeline_mode = #tpu.pipeline_mode<synchronous>, transform_indices = @transform_5, window_bounds = array<i64: 64, 64>}, {pipeline_mode = #tpu.pipeline_mode<synchronous>, transform_indices = @transform_6, window_bounds = array<i64: 1, 64>}, {pipeline_mode = #tpu.pipeline_mode<synchronous>, transform_indices = @transform_7, window_bounds = array<i64: 64, 128>}, {pipeline_mode = #tpu.pipeline_mode<synchronous>, transform_indices = @transform_8, window_bounds = array<i64: 1, 128>}, {transform_indices = @transform_9, window_bounds = array<i64: 8, 128>}]} {
    %c0 = arith.constant 0 : index
    %c0_0 = arith.constant 0 : index
    %0 = vector.load %arg1[%c0, %c0_0] : memref<8x8xf32, #tpu.memory_space<vmem>>, vector<8x8xf32>
    %c0_1 = arith.constant 0 : index
    %c0_2 = arith.constant 0 : index
    %1 = vector.load %arg3[%c0_1, %c0_2] : memref<8x64xf32, #tpu.memory_space<vmem>>, vector<8x64xf32>
    %cst = arith.constant dense<0.000000e+00> : vector<8x64xf32>
    %2 = tpu.matmul %0, %1, %cst {dimension_numbers = #tpu.dot_dimension_numbers<[1], [0], [0], [1], [0, 0, 1, 1], [], []>} : vector<8x8xf32>, vector<8x64xf32>, vector<8x64xf32> -> vector<8x64xf32>
    %c0_3 = arith.constant 0 : index
    %c0_4 = arith.constant 0 : index
    %3 = vector.load %arg2[%c0_3, %c0_4] : memref<8x4xf32, #tpu.memory_space<vmem>>, vector<8x4xf32>
    %c0_5 = arith.constant 0 : index
    %c0_6 = arith.constant 0 : index
    %4 = vector.load %arg4[%c0_5, %c0_6] : memref<4x64xf32, #tpu.memory_space<vmem>>, vector<4x64xf32>
    %cst_7 = arith.constant dense<0.000000e+00> : vector<8x64xf32>
    %5 = tpu.matmul %3, %4, %cst_7 {dimension_numbers = #tpu.dot_dimension_numbers<[1], [0], [0], [1], [0, 0, 1, 1], [], []>} : vector<8x4xf32>, vector<4x64xf32>, vector<8x64xf32> -> vector<8x64xf32>
    %6 = arith.addf %2, %5 : vector<8x64xf32>
    %c0_8 = arith.constant 0 : index
    %c0_9 = arith.constant 0 : index
    %7 = vector.load %arg5[%c0_8, %c0_9] : memref<1x64xf32, #tpu.memory_space<vmem>>, vector<1x64xf32>
    %8 = vector.broadcast %7 : vector<1x64xf32> to vector<8x64xf32>
    %9 = arith.addf %6, %8 : vector<8x64xf32>
    %cst_10 = arith.constant 0.000000e+00 : f32
    %10 = vector.broadcast %cst_10 : f32 to vector<8x64xf32>
    %11 = arith.maximumf %9, %10 : vector<8x64xf32>
    %c0_11 = arith.constant 0 : index
    %c0_12 = arith.constant 0 : index
    %12 = vector.load %arg6[%c0_11, %c0_12] : memref<64x64xf32, #tpu.memory_space<vmem>>, vector<64x64xf32>
    %cst_13 = arith.constant dense<0.000000e+00> : vector<8x64xf32>
    %13 = tpu.matmul %11, %12, %cst_13 {dimension_numbers = #tpu.dot_dimension_numbers<[1], [0], [0], [1], [0, 0, 1, 1], [], []>} : vector<8x64xf32>, vector<64x64xf32>, vector<8x64xf32> -> vector<8x64xf32>
    %c0_14 = arith.constant 0 : index
    %c0_15 = arith.constant 0 : index
    %14 = vector.load %arg7[%c0_14, %c0_15] : memref<1x64xf32, #tpu.memory_space<vmem>>, vector<1x64xf32>
    %15 = vector.broadcast %14 : vector<1x64xf32> to vector<8x64xf32>
    %16 = arith.addf %13, %15 : vector<8x64xf32>
    %cst_16 = arith.constant 0.000000e+00 : f32
    %17 = vector.broadcast %cst_16 : f32 to vector<8x64xf32>
    %18 = arith.maximumf %16, %17 : vector<8x64xf32>
    %c0_17 = arith.constant 0 : index
    %c0_18 = arith.constant 0 : index
    %19 = vector.load %arg8[%c0_17, %c0_18] : memref<64x128xf32, #tpu.memory_space<vmem>>, vector<64x128xf32>
    %cst_19 = arith.constant dense<0.000000e+00> : vector<8x128xf32>
    %20 = tpu.matmul %18, %19, %cst_19 {dimension_numbers = #tpu.dot_dimension_numbers<[1], [0], [0], [1], [0, 0, 1, 1], [], []>} : vector<8x64xf32>, vector<64x128xf32>, vector<8x128xf32> -> vector<8x128xf32>
    %c0_20 = arith.constant 0 : index
    %c0_21 = arith.constant 0 : index
    %21 = vector.load %arg9[%c0_20, %c0_21] : memref<1x128xf32, #tpu.memory_space<vmem>>, vector<1x128xf32>
    %22 = vector.broadcast %21 : vector<1x128xf32> to vector<8x128xf32>
    %23 = arith.addf %20, %22 : vector<8x128xf32>
    %c0_22 = arith.constant 0 : index
    %c0_23 = arith.constant 0 : index
    %24 = vector.load %arg10[%c0_22, %c0_23] : memref<8x128xf32, #tpu.memory_space<vmem>>, vector<8x128xf32>
    tpu.vector_store %arg10[%c0_22, %c0_23], %23 {strides = array<i32>} : memref<8x128xf32, #tpu.memory_space<vmem>>, vector<8x128xf32>,
    return
  }
  func.func @transform_0(%arg0: i32) -> (i32, i32) {
    %c0_i32 = arith.constant 0 : i32
    %c0_i32_0 = arith.constant 0 : i32
    return %arg0, %c0_i32 : i32, i32
  }
  func.func @transform_1(%arg0: i32) -> (i32, i32) {
    %c0_i32 = arith.constant 0 : i32
    %c0_i32_0 = arith.constant 0 : i32
    return %arg0, %c0_i32 : i32, i32
  }
  func.func @transform_2(%arg0: i32) -> (i32, i32) {
    %c0_i32 = arith.constant 0 : i32
    %c0_i32_0 = arith.constant 0 : i32
    %c0_i32_1 = arith.constant 0 : i32
    return %c0_i32, %c0_i32_0 : i32, i32
  }
  func.func @transform_3(%arg0: i32) -> (i32, i32) {
    %c0_i32 = arith.constant 0 : i32
    %c0_i32_0 = arith.constant 0 : i32
    %c0_i32_1 = arith.constant 0 : i32
    return %c0_i32, %c0_i32_0 : i32, i32
  }
  func.func @transform_4(%arg0: i32) -> (i32, i32) {
    %c0_i32 = arith.constant 0 : i32
    %c0_i32_0 = arith.constant 0 : i32
    %c0_i32_1 = arith.constant 0 : i32
    return %c0_i32, %c0_i32_0 : i32, i32
  }
  func.func @transform_5(%arg0: i32) -> (i32, i32) {
    %c0_i32 = arith.constant 0 : i32
    %c0_i32_0 = arith.constant 0 : i32
    %c0_i32_1 = arith.constant 0 : i32
    return %c0_i32, %c0_i32_0 : i32, i32
  }
  func.func @transform_6(%arg0: i32) -> (i32, i32) {
    %c0_i32 = arith.constant 0 : i32
    %c0_i32_0 = arith.constant 0 : i32
    %c0_i32_1 = arith.constant 0 : i32
    return %c0_i32, %c0_i32_0 : i32, i32
  }
  func.func @transform_7(%arg0: i32) -> (i32, i32) {
    %c0_i32 = arith.constant 0 : i32
    %c0_i32_0 = arith.constant 0 : i32
    %c0_i32_1 = arith.constant 0 : i32
    return %c0_i32, %c0_i32_0 : i32, i32
  }
  func.func @transform_8(%arg0: i32) -> (i32, i32) {
    %c0_i32 = arith.constant 0 : i32
    %c0_i32_0 = arith.constant 0 : i32
    %c0_i32_1 = arith.constant 0 : i32
    return %c0_i32, %c0_i32_0 : i32, i32
  }
  func.func @transform_9(%arg0: i32) -> (i32, i32) {
    %c0_i32 = arith.constant 0 : i32
    %c0_i32_0 = arith.constant 0 : i32
    return %arg0, %c0_i32 : i32, i32
  }
}

</mosaic_0001>

<bundles_post_ra>
// kernel: critic_forward.1
= control target key start
LH: loop header
LB: loop body
LE: loop exit
PB: predicated region body
PF: predicated region fallthrough
CT: control target
= control target key end

     0   :  { %14 = vsyncpa [#allocation3], 0  ;;  %s676_s0 = inlined_call_operand.vmem [shape: f32[8,8], index: 0, kind: input, shape index: {}]   ;;  %s677_s1 = inlined_call_operand.vmem [shape: f32[8,4], index: 1, kind: input, shape index: {}]   ;;  %s678_s2 = inlined_call_operand.vmem [shape: f32[8,64], index: 2, kind: input, shape index: {}]   ;;  %s679_s3 = inlined_call_operand.vmem [shape: f32[4,64], index: 3, kind: input, shape index: {}]   ;;  %s680_s4 = inlined_call_operand.vmem [shape: f32[1,64], index: 4, kind: input, shape index: {}]   ;;  %s681_s5 = inlined_call_operand.hbm [shape: f32[64,64], index: 5, kind: input, shape index: {}]   ;;  %s682_s6 = inlined_call_operand.vmem [shape: f32[1,64], index: 6, kind: input, shape index: {}]   ;;  %s683_s7 = inlined_call_operand.hbm [shape: f32[64,128], index: 7, kind: input, shape index: {}]   ;;  %s684_s8 = inlined_call_operand.vmem [shape: f32[1,128], index: 8, kind: input, shape index: {}]   ;;  %s685_s9 = inlined_call_operand.vmem [shape: f32[8,128], index: 9, kind: output, shape index: {}]  }
   0x1   :  { %15 = vsyncpa [#allocation5], 0  ;;  %s567_s30 = smov [#allocation2]   ;;  %s519_s13 = scalar_lea.hbm %s681_s5, 1024 }
   0x2   :  { %s31_s10 = sshll.u32 %s567_s30, 4  ;;  %p520_p0 = scmp.ne.s32.totalorder %s681_s5, %s519_s13  ;;  %s32_s10 = int_to_ptr.vmem [resolvable:$true] %s31_s10 }
   0x3   :  { %p523_p1 = scmp.lt.u32.totalorder %s519_s13, %s681_s5 }
   0x5   :  { %p525_p2 = pnand %p523_p1, %p520_p0 }
   0x7   :  { %528 = shalt.err (!%p525_p2)
}
   0x8   :  { %s529_s18 = scalar_lea.vmem %s32_s10, 1024  ;;  %p534_p4 = scmp.lt.s32.totalorder %s32_s10, %s32_s10 }
   0x9   :  { %p530_p3 = scmp.ne.s32.totalorder %s32_s10, %s529_s18  ;;  %p535_p5 = scmp.lt.s32.totalorder %s529_s18, %s529_s18 }
   0xb   :  { %p536_p6 = por %p535_p5, %p534_p4 }
   0xd   :  { %p537_p7 = pnand %p536_p6, %p530_p3 }
   0xf   :  { %540 = shalt.err (!%p537_p7)
}
  0x10   :  { %s568_s19 = smov 128   ;;  %s569_s20 = smov 8  }
  0x11   :  { %37 = dma.hbm_to_vmem [thread:$0]  %s681_s5, 1024, %s32_s10, [#allocation3], %s568_s19, %s568_s19, %s569_s20  }
  0x12   :  { %s570_s23 = smov [#allocation4]   ;;  %s541_s27 = scalar_lea.hbm %s683_s7, 1024 }
  0x13   :  { %s45_s24 = sshll.u32 %s570_s23, 4  ;;  %p542_p8 = scmp.ne.s32.totalorder %s683_s7, %s541_s27  ;;  %s46_s24 = int_to_ptr.vmem [resolvable:$true] %s45_s24 }
  0x14   :  { %p545_p9 = scmp.lt.u32.totalorder %s541_s27, %s683_s7 }
  0x16   :  { %p547_p10 = pnand %p545_p9, %p542_p8 }
  0x18   :  { %550 = shalt.err (!%p547_p10)
}
  0x19   :  { %s551_s12 = scalar_lea.vmem %s46_s24, 1024  ;;  %p556_p12 = scmp.lt.s32.totalorder %s46_s24, %s46_s24 }
  0x1a   :  { %p552_p11 = scmp.ne.s32.totalorder %s46_s24, %s551_s12  ;;  %p557_p13 = scmp.lt.s32.totalorder %s551_s12, %s551_s12 }
  0x1c   :  { %p558_p0 = por %p557_p13, %p556_p12 }
  0x1e   :  { %p559_p1 = pnand %p558_p0, %p552_p11 }
  0x20   :  { %562 = shalt.err (!%p559_p1)
}
  0x21   :  { %51 = dma.hbm_to_vmem [thread:$0]  %s683_s7, 1024, %s46_s24, [#allocation5], %s568_s19, %s568_s19, %s569_s20  }
  0x22   :  { %563 = dma.done.wait [#allocation3], 1024  }
  0x23   :  { %564 = vsyncadd [#allocation3], 4294966272 }
  0x24   :  { %565 = dma.done.wait [#allocation5], 1024  }
  0x25   :  { %566 = vsyncadd [#allocation5], 4294966272  ;;  %v571_v0 = vmov 0.0   ;;  %vm572_vm0 = vmmov 0   ;;  %vm68_vm1 = vcmask 1043456   ;;  %vm64_vm2 = vcmask 31744  }
  0x26   :  { %440 = vmatprep.subr.mxu0 %v571_v0  ;;  %445 = vmatprep.subr.mxu1 %v571_v0  ;;  %vm142_vm3 = vcmask 64512   ;;  %v63_v1 = vld [vmem:[%s679_s3] sm:$0xf]  ;;  %v226_v6 = vld [vmem:[#allocation2 + $0x8] sm:$0xff]  ;;  %v227_v8 = vld [vmem:[#allocation2 + $0x10] sm:$0xff]  ;;  %v573_v10 = vmov 0.0|0.0  }
  0x27   :  { %442 = vmatprep.mubr.msk.f32.mxu0 %vm572_vm0, %v571_v0  ;;  %447 = vmatprep.mubr.msk.f32.mxu1 %vm572_vm0, %v571_v0  ;;  %v61_v2 = vld [vmem:[%s678_s2] sm:$0xff]  ;;  %v228_v9 = vld [vmem:[#allocation2 + $0x18] sm:$0xff]  ;;  %v230_v13 = vld [vmem:[#allocation2 + $0x28] sm:$0xff]  ;;  %vm240_vm4 = vcmask 523264  }
  0x28   :  { %v62_v3 = vld [vmem:[%s677_s1] sm:$0xff]  ;;  %441 = vmatpush3.msk.msra.mxu0 %vm68_vm1, %v63_v1  ;;  %446 = vmatpush3.msra.mxu1 %v61_v2  ;;  %v492_v11 = vpack.c.bf16 %v228_v9, %v227_v8  ;;  %v231_v15 = vld [vmem:[#allocation2 + $0x30] sm:$0xff]  ;;  %v232_v16 = vld [vmem:[#allocation2 + $0x38] sm:$0xff] }
  0x29   :  { %v60_v4 = vld [vmem:[%s676_s0] sm:$0xff]  ;;  %443 = vmatmul.mubr.msk.f32.vlgmr.msra.gmra.mrb[0].mxu0 %vm64_vm2, %v62_v3  ;;  %488 = vmatprep.subr.bf16.mxu0 %v573_v10  ;;  %v498_v17 = vpack.c.bf16 %v232_v16, %v231_v15  ;;  %v316_v19 = vld [vmem:[#allocation4 + $0x8] sm:$0xff]  ;;  %v317_v20 = vld [vmem:[#allocation4 + $0x10] sm:$0xff] }
  0x2a   :  { %v225_v5 = vld [vmem:[#allocation2] sm:$0xff]  ;;  %448 = vmatmul.mubr.msk.f32.vlgmr.msra.gmra.mrb[0].mxu1 %vm142_vm3, %v60_v4  ;;  %466 = vmatprep.mubr.msk.f32.mxu0 %vm572_vm0, %v571_v0  ;;  %v318_v22 = vld [vmem:[#allocation4 + $0x18] sm:$0xff]  ;;  %v320_v25 = vld [vmem:[#allocation4 + $0x28] sm:$0xff] }
  0x2b   :  { %v489_v7 = vpack.c.bf16 %v226_v6, %v225_v5  ;;  %500 = vmatprep.subr.bf16.mxu1 %v573_v10  ;;  %485 = vmatprep.mubr.msk.f32.mxu1 %vm572_vm0, %v571_v0  ;;  %v229_v12 = vld [vmem:[#allocation2 + $0x20] sm:$0xff]  ;;  %v504_v23 = vpack.c.bf16 %v318_v22, %v317_v20  ;;  %v321_v35 = vld [vmem:[#allocation4 + $0x30] sm:$0xff]  ;;  %v322_v36 = vld [vmem:[#allocation4 + $0x38] sm:$0xff] }
  0x2c   :  { %v495_v14 = vpack.c.bf16 %v230_v13, %v229_v12  ;;  %v315_v18 = vld [vmem:[#allocation4] sm:$0xff]  ;;  %v510_v37 = vpack.c.bf16 %v322_v36, %v321_v35 }
  0x2d   :  { %490 = vmatpush3.bf16.msra.mxu0 %v489_v7  ;;  %v501_v21 = vpack.c.bf16 %v316_v19, %v315_v18  ;;  %v319_v24 = vld [vmem:[#allocation4 + $0x20] sm:$0xff] }
  0x2e   :  { %491 = vmatprep.subr.bf16.mxu0 %v573_v10  ;;  %v507_v26 = vpack.c.bf16 %v320_v25, %v319_v24  ;;  %v413_v29 = vld [vmem:[%s680_s4] ss:$0 sm:$0xff] }
  0x2f   :  { %502 = vmatpush3.bf16.msra.mxu1 %v501_v21  ;;  %v414_v38 = vld [vmem:[%s682_s6] ss:$0 sm:$0xff] }
  0x30   :  { %503 = vmatprep.subr.bf16.mxu1 %v573_v10  ;;  %v416_v43 = vld [vmem:[%s684_s8] ss:$0 sm:$0xff] }
  0x31   :  { %493 = vmatpush3.bf16.msra.mxu0 %v492_v11 }
  0x32   :  { %494 = vmatprep.subr.bf16.mxu0 %v573_v10 }
  0x33   :  { %505 = vmatpush3.bf16.msra.mxu1 %v504_v23 }
  0x34   :  { %506 = vmatprep.subr.bf16.mxu1 %v573_v10 }
  0x35   :  { %496 = vmatpush3.bf16.msra.mxu0 %v495_v14 }
  0x36   :  { %497 = vmatprep.subr.bf16.mxu0 %v573_v10 }
  0x37   :  { %508 = vmatpush3.bf16.msra.mxu1 %v507_v26 }
  0x38   :  { %509 = vmatprep.subr.bf16.mxu1 %v573_v10 }
  0x39   :  { %499 = vmatpush3.bf16.msra.mxu0 %v498_v17 }
  0x3b   :  { %511 = vmatpush3.bf16.msra.mxu1 %v510_v37 }
  0xfc   :  { %v138_v27 = vpop.f32.mrb[0].mxu0 }
  0xfd   :  { %v212_v28 = vpop.f32.mrb[0].mxu1  ;;  %v444_v31 = vpop.f32.mrb[1].mxu0 }
  0xfe   :  { %v213_v30 = vadd.f32 %v212_v28, %v138_v27  ;;  %v449_v32 = vpop.f32.mrb[1].mxu1 }
 0x100   :  { %v223_v33 = vadd.f32 %v413_v29, %v213_v30 }
 0x102   :  { %v224_v34 = vmax.f32 %v223_v33, 0.0 }
 0x104   :  { %467 = vmatmul.mubr.msk.f32.vlgmr.msra.gmra.mrb[2].mxu0 %vm240_vm4, %v224_v34 }
 0x1d7   :  { %v310_v39 = vpop.f32.mrb[2].mxu0 }
 0x1d8   :  { %v311_v40 = vadd.f32 %v414_v38, %v310_v39  ;;  %v468_v41 = vpop.f32.mrb[3].mxu0 }
 0x1da   :  { %v314_v42 = vmax.f32 %v311_v40, 0.0 }
 0x1dc   :  { %486 = vmatmul.mubr.msk.f32.vlgmr.msra.gmra.mrb[2].mxu1 %vm240_vm4, %v314_v42 }
 0x2af   :  { %v399_v44 = vpop.f32.mrb[2].mxu1 }
 0x2b0   :  { %v400_v45 = vadd.f32 %v416_v43, %v399_v44  ;;  %v487_v46 = vpop.f32.mrb[3].mxu1 }
 0x2b2   :  { %403 = vst [vmem:[%s685_s9] sm:$0xff] %v400_v45 }
 0x2b3   :  { %408 = vsyncpa [#allocation3], 1 }
 0x2b4   :  { %409 = vsyncpa [#allocation5], 1 }

</bundles_post_ra>
